<compile_context>
chip_gen: v7x
topology: tpu7x:2x2x1
jax: 0.10.0
libtpu: 0.0.40
codegen_flags: <defaults>
</compile_context>

<pallas_src>
import jax
import jax.numpy as jnp
from jax.experimental import pallas as pl
from jax.experimental.pallas import tpu as pltpu


def _round_up(x: int, m: int) -> int:
    return ((x + m - 1) // m) * m


def _num_tensorcores() -> int:
    """Best-effort TensorCores-per-chip (v7x: 2, v5e/v6e: 1); falls back to 1."""
    try:
        info = pltpu.get_tpu_info()
        for attr in ("num_cores", "num_tensorcores", "tensorcore_count",
                     "cores_per_chip", "num_tensor_cores"):
            n = getattr(info, attr, None)
            if n is None:
                continue
            try:
                n = int(n)
            except Exception:
                continue
            if n > 0:
                return n
    except Exception:
        pass
    try:
        n = getattr(jax.devices()[0], "num_cores", None)
        if n is not None and int(n) > 0:
            return int(n)
    except Exception:
        pass
    return 1


def _hadamard_kernel(x_ref, w_ref, b_ref, o_ref):
    # x_ref: (tm, D)   w_ref: (D, 2D)   b_ref: (1, 2D) f32   o_ref: (tm, D)
    D = o_ref.shape[-1]
    # In-kernel MXU-dtype cast: free compared to a wrapper-side astype, which
    # would add a full extra HBM pass over x on a memory-bound kernel.
    x = x_ref[...].astype(w_ref.dtype)
    y = jnp.dot(x, w_ref[...], preferred_element_type=jnp.float32)
    y = y + b_ref[...]                                  # bias add in f32
    # Lane-aligned split at column D (D is a multiple of 128) -> free slices.
    o_ref[...] = (y[:, :D] * y[:, D:]).astype(o_ref.dtype)


def fuse_hadamard_params(w1, b1, w2, b2, *, mxu_dtype=None):
    """Fuse the two Linear layers once per model (hoisted out of the token path).

    w1, w2 : [D, D]  weights already transposed to (in, out) layout, i.e. W.T
    b1, b2 : [D]
    mxu_dtype : optionally store the fused weight in a narrower dtype (e.g.
                jnp.bfloat16); x is cast to match inside the kernel and the
                accumulation stays f32.
    """
    w12 = jnp.concatenate([w1, w2], axis=1)                          # (D, 2D)
    if mxu_dtype is not None:
        w12 = w12.astype(mxu_dtype)
    b12 = jnp.concatenate([b1, b2], axis=0).astype(jnp.float32).reshape(1, -1)
    return w12, b12


def hadamard_feature_map(x, w12, b12, *, tm=4096, out_dtype=None):
    """out = (x @ w1 + b1) * (x @ w2 + b2), with (w12, b12) from fuse_hadamard_params.

    x   : [..., D]
    w12 : [D, 2D]   b12 : [1, 2D] (f32)
    tm  : requested row tile (rows of flattened x per grid step)
    out_dtype : optionally narrow the output (e.g. jnp.bfloat16) to cut
                writeback traffic; compute stays in f32.
    """
    orig_shape = x.shape
    D = orig_shape[-1]
    assert w12.shape == (D, 2 * D) and b12.shape == (1, 2 * D)
    out_dtype = x.dtype if out_dtype is None else jnp.dtype(out_dtype)

    x2d = x.reshape(-1, D)
    N = x2d.shape[0]

    # Sublane alignment for the row tile: 8 for 32-bit VMEM blocks, 16 when
    # either the x block or the output block is 16-bit (packed vregs).
    min_bytes = min(jnp.dtype(x.dtype).itemsize, jnp.dtype(out_dtype).itemsize)
    row_align = 8 * max(1, 4 // max(1, min_bytes))

    # Row tile: as large as requested, capped so multi-TensorCore chips (v7x)
    # get >= 2 grid steps per core (keeps the per-core software pipeline
    # alive); single-TC chips (v5e/v6e) are not force-split -- their grid is a
    # serial loop, so splitting only doubles the per-step overhead.
    n_cores = _num_tensorcores()
    target_steps = 2 * n_cores if n_cores > 1 else 1
    tm_cap = _round_up(max(1, pl.cdiv(N, target_steps)), row_align)
    tm_eff = max(row_align, min(_round_up(int(tm), row_align), tm_cap))

    # Ragged grid: no host-side padding / output slicing (each would be an
    # extra full HBM pass).  Pallas clips the last block's DMAs to the array
    # bounds; every row is computed independently, so stale rows in the last
    # block's VMEM buffer are never written back.
    # NOTE: do not add any cross-row reduction to this kernel without
    # re-introducing explicit padding of the last block.
    grid = (pl.cdiv(N, tm_eff),)

    x_bytes = jnp.dtype(x.dtype).itemsize
    w_bytes = jnp.dtype(w12.dtype).itemsize
    o_bytes = jnp.dtype(out_dtype).itemsize
    cost = pl.CostEstimate(
        flops=2 * N * D * (2 * D) + 3 * N * D,          # matmul + bias + mul
        transcendentals=0,
        bytes_accessed=(N * D * x_bytes + N * D * o_bytes
                        + D * 2 * D * w_bytes + 2 * D * 4),
    )

    # VMEM at tm=4096, D=128, f32: ~2 MiB x + ~2 MiB out (x2 double-buffered)
    # + ~4 MiB f32 y intermediate + ~0.25 MiB resident weights ~= 13 MiB,
    # within the 32 MiB default scoped limit on all generations (v7x physical
    # VMEM = 64 MiB).  The constant-index weight/bias blocks are fetched once
    # and stay resident; their double buffer wastes only ~2*D*2D*itemsize at
    # D=128 (consider pipeline_mode=pl.Buffered(1) on them if D scales up).
    out = pl.pallas_call(
        _hadamard_kernel,
        out_shape=jax.ShapeDtypeStruct((N, D), out_dtype),
        grid_spec=pl.GridSpec(
            grid=grid,
            in_specs=[
                pl.BlockSpec((tm_eff, D), lambda i: (i, 0)),      # x row tile
                pl.BlockSpec((D, 2 * D), lambda i: (0, 0)),       # fused W (resident)
                pl.BlockSpec((1, 2 * D), lambda i: (0, 0)),       # fused bias
            ],
            out_specs=pl.BlockSpec((tm_eff, D), lambda i: (i, 0)),
        ),
        compiler_params=pltpu.CompilerParams(
            dimension_semantics=("parallel",),
        ),
        cost_estimate=cost,
    )(x2d, w12, b12)

    return out.reshape(orig_shape)


def _reference(x, w1_t, b1, w2_t, b2):
    y1 = jnp.dot(x, w1_t) + b1
    y2 = jnp.dot(x, w2_t) + b2
    return y1 * y2


if __name__ == "__main__":
    head_dim = 128

    key = jax.random.PRNGKey(0)
    kx1, kx2, kx3, kw1, kb1, kw2, kb2 = jax.random.split(key, 7)

    # Deterministic "nn.Linear"-style parameters (uniform init bound).
    bound = 1.0 / (head_dim ** 0.5)
    # Weights stored as [in, out] = W.T so the kernel computes x @ W_t + b.
    w1_t = jax.random.uniform(kw1, (head_dim, head_dim), jnp.float32, -bound, bound)
    b1 = jax.random.uniform(kb1, (head_dim,), jnp.float32, -bound, bound)
    w2_t = jax.random.uniform(kw2, (head_dim, head_dim), jnp.float32, -bound, bound)
    b2 = jax.random.uniform(kb2, (head_dim,), jnp.float32, -bound, bound)

    # Fuse once per model (hoisted out of the per-call path).
    w12_f32, b12 = fuse_hadamard_params(w1_t, b1, w2_t, b2)
    w12_bf16, _ = fuse_hadamard_params(w1_t, b1, w2_t, b2, mxu_dtype=jnp.bfloat16)

    # Case 1: (batch, seq) = (2, 8) -> 16 rows, f32 end to end (tight ref).
    x = jax.random.normal(kx1, (2, 8, head_dim), dtype=jnp.float32)
    out = jax.block_until_ready(hadamard_feature_map(x, w12_f32, b12))
    ref = _reference(x, w1_t, b1, w2_t, b2)
    assert out.shape == x.shape and out.dtype == x.dtype
    assert jnp.allclose(out, ref, atol=1e-4, rtol=1e-4), "mismatch (case 1, f32)"

    # Case 2: 15 rows -> ragged last block, no host-side padding.
    x_odd = jax.random.normal(kx2, (3, 5, head_dim), dtype=jnp.float32)
    out_odd = jax.block_until_ready(hadamard_feature_map(x_odd, w12_f32, b12))
    ref_odd = _reference(x_odd, w1_t, b1, w2_t, b2)
    assert out_odd.shape == x_odd.shape
    assert jnp.allclose(out_odd, ref_odd, atol=1e-4, rtol=1e-4), "mismatch (case 2, ragged)"

    # Case 3: multiple grid steps + ragged tail (tm forced small), f32.
    x_multi = jax.random.normal(kx3, (4, 33, head_dim), dtype=jnp.float32)   # 132 rows
    out_multi = jax.block_until_ready(hadamard_feature_map(x_multi, w12_f32, b12, tm=64))
    ref_multi = _reference(x_multi, w1_t, b1, w2_t, b2)
    assert jnp.allclose(out_multi, ref_multi, atol=1e-4, rtol=1e-4), \
        "mismatch (case 3, multi-step)"

    # Case 4: bf16 MXU operands (in-kernel x cast) + bf16 output, looser tol.
    out_bf16 = jax.block_until_ready(
        hadamard_feature_map(x_multi, w12_bf16, b12, tm=64, out_dtype=jnp.bfloat16))
    assert out_bf16.shape == x_multi.shape and out_bf16.dtype == jnp.bfloat16
    assert jnp.allclose(out_bf16.astype(jnp.float32), ref_multi, atol=1e-1, rtol=5e-2), \
        "mismatch (case 4, bf16)"

    print("KERNEL_OK")
</pallas_src>

<mosaic_0001>
module attributes {stable_mosaic.version = 11 : i64} {
  func.func @_hadamard_kernel(%arg0: i32, %arg1: memref<16x128xf32, #tpu.memory_space<vmem>>, %arg2: memref<128x256xf32, #tpu.memory_space<vmem>>, %arg3: memref<1x256xf32, #tpu.memory_space<vmem>>, %arg4: memref<16x128xf32, #tpu.memory_space<vmem>>) attributes {dimension_semantics = [#tpu.dimension_semantics<parallel>], iteration_bounds = array<i64: 1>, scalar_prefetch = 0 : i64, scratch_operands = 0 : i64, tpu.core_type = #tpu.core_type<tc>, window_params = [{transform_indices = @transform_0, window_bounds = array<i64: 16, 128>}, {pipeline_mode = #tpu.pipeline_mode<synchronous>, transform_indices = @transform_1, window_bounds = array<i64: 128, 256>}, {pipeline_mode = #tpu.pipeline_mode<synchronous>, transform_indices = @transform_2, window_bounds = array<i64: 1, 256>}, {transform_indices = @transform_3, window_bounds = array<i64: 16, 128>}]} {
    %c0 = arith.constant 0 : index
    %c0_0 = arith.constant 0 : index
    %0 = vector.load %arg1[%c0, %c0_0] : memref<16x128xf32, #tpu.memory_space<vmem>>, vector<16x128xf32>
    %c0_1 = arith.constant 0 : index
    %c0_2 = arith.constant 0 : index
    %1 = vector.load %arg2[%c0_1, %c0_2] : memref<128x256xf32, #tpu.memory_space<vmem>>, vector<128x256xf32>
    %cst = arith.constant dense<0.000000e+00> : vector<16x256xf32>
    %2 = tpu.matmul %0, %1, %cst {dimension_numbers = #tpu.dot_dimension_numbers<[1], [0], [0], [1], [0, 0, 1, 1], [], []>} : vector<16x128xf32>, vector<128x256xf32>, vector<16x256xf32> -> vector<16x256xf32>
    %c0_3 = arith.constant 0 : index
    %c0_4 = arith.constant 0 : index
    %3 = vector.load %arg3[%c0_3, %c0_4] : memref<1x256xf32, #tpu.memory_space<vmem>>, vector<1x256xf32>
    %4 = vector.broadcast %3 : vector<1x256xf32> to vector<16x256xf32>
    %5 = arith.addf %2, %4 : vector<16x256xf32>
    %6 = vector.extract_strided_slice %5 {offsets = [0, 0], sizes = [16, 128], strides = [1, 1]} : vector<16x256xf32> to vector<16x128xf32>
    %7 = vector.extract_strided_slice %5 {offsets = [0, 128], sizes = [16, 128], strides = [1, 1]} : vector<16x256xf32> to vector<16x128xf32>
    %8 = arith.mulf %6, %7 : vector<16x128xf32>
    %c0_5 = arith.constant 0 : index
    %c0_6 = arith.constant 0 : index
    %9 = vector.load %arg4[%c0_5, %c0_6] : memref<16x128xf32, #tpu.memory_space<vmem>>, vector<16x128xf32>
    tpu.vector_store %arg4[%c0_5, %c0_6], %8 {strides = array<i32>} : memref<16x128xf32, #tpu.memory_space<vmem>>, vector<16x128xf32>,
    return
  }
  func.func @transform_0(%arg0: i32) -> (i32, i32) {
    %c0_i32 = arith.constant 0 : i32
    %c0_i32_0 = arith.constant 0 : i32
    return %arg0, %c0_i32 : i32, i32
  }
  func.func @transform_1(%arg0: i32) -> (i32, i32) {
    %c0_i32 = arith.constant 0 : i32
    %c0_i32_0 = arith.constant 0 : i32
    %c0_i32_1 = arith.constant 0 : i32
    return %c0_i32, %c0_i32_0 : i32, i32
  }
  func.func @transform_2(%arg0: i32) -> (i32, i32) {
    %c0_i32 = arith.constant 0 : i32
    %c0_i32_0 = arith.constant 0 : i32
    %c0_i32_1 = arith.constant 0 : i32
    return %c0_i32, %c0_i32_0 : i32, i32
  }
  func.func @transform_3(%arg0: i32) -> (i32, i32) {
    %c0_i32 = arith.constant 0 : i32
    %c0_i32_0 = arith.constant 0 : i32
    return %arg0, %c0_i32 : i32, i32
  }
}

</mosaic_0001>

<bundles_post_ra>
// kernel: tpu_custom_call.1
= control target key start
LH: loop header
LB: loop body
LE: loop exit
PB: predicated region body
PF: predicated region fallthrough
CT: control target
= control target key end

     0   :  { %8 = vsyncpa [#allocation3], 0  ;;  %s389_s0 = inlined_call_operand.hbm [shape: f32[16,128], index: 0, kind: input, shape index: {}]   ;;  %s390_s1 = inlined_call_operand.hbm [shape: f32[128,256], index: 1, kind: input, shape index: {}]   ;;  %s391_s2 = inlined_call_operand.vmem [shape: f32[1,256], index: 2, kind: input, shape index: {}]   ;;  %s392_s3 = inlined_call_operand.hbm [shape: f32[16,128], index: 3, kind: output, shape index: {}]  }
   0x1   :  { %9 = vsyncpa [#allocation6], 0 }
   0x2   :  { %10 = vsyncpa [#allocation4], 0  ;;  %s316_s12 = smov [#allocation2]   ;;  %s244_s16 = scalar_lea.hbm %s389_s0, 256 }
   0x3   :  { %s16_s13 = sshll.u32 %s316_s12, 4  ;;  %p245_p0 = scmp.ne.s32.totalorder %s389_s0, %s244_s16  ;;  %s17_s13 = int_to_ptr.vmem [resolvable:$true] %s16_s13 }
   0x4   :  { %p248_p1 = scmp.lt.u32.totalorder %s244_s16, %s389_s0 }
   0x6   :  { %p250_p2 = pnand %p248_p1, %p245_p0 }
   0x8   :  { %253 = shalt.err (!%p250_p2)
}
   0x9   :  { %s254_s21 = scalar_lea.vmem %s17_s13, 256  ;;  %p259_p4 = scmp.lt.s32.totalorder %s17_s13, %s17_s13 }
   0xa   :  { %p255_p3 = scmp.ne.s32.totalorder %s17_s13, %s254_s21  ;;  %p260_p5 = scmp.lt.s32.totalorder %s254_s21, %s254_s21 }
   0xc   :  { %p261_p6 = por %p260_p5, %p259_p4 }
   0xe   :  { %p262_p7 = pnand %p261_p6, %p255_p3 }
  0x10   :  { %265 = shalt.err (!%p262_p7)
}
  0x11   :  { %s317_s22 = smov 128   ;;  %s318_s23 = smov 8  }
  0x12   :  { %22 = dma.hbm_to_vmem [thread:$0]  %s389_s0, 256, %s17_s13, [#allocation3], %s317_s22, %s317_s22, %s318_s23  }
  0x13   :  { %s319_s26 = smov [#allocation5]   ;;  %s266_s30 = scalar_lea.hbm %s390_s1, 4096 }
  0x14   :  { %s28_s27 = sshll.u32 %s319_s26, 4  ;;  %p267_p8 = scmp.ne.s32.totalorder %s390_s1, %s266_s30  ;;  %s29_s27 = int_to_ptr.vmem [resolvable:$true] %s28_s27 }
  0x15   :  { %p270_p9 = scmp.lt.u32.totalorder %s266_s30, %s390_s1 }
  0x17   :  { %p272_p10 = pnand %p270_p9, %p267_p8 }
  0x19   :  { %275 = shalt.err (!%p272_p10)
}
  0x1a   :  { %s276_s8 = scalar_lea.vmem %s29_s27, 4096  ;;  %p281_p12 = scmp.lt.s32.totalorder %s29_s27, %s29_s27 }
  0x1b   :  { %p277_p11 = scmp.ne.s32.totalorder %s29_s27, %s276_s8  ;;  %p282_p13 = scmp.lt.s32.totalorder %s276_s8, %s276_s8 }
  0x1d   :  { %p283_p0 = por %p282_p13, %p281_p12 }
  0x1f   :  { %p284_p1 = pnand %p283_p0, %p277_p11 }
  0x21   :  { %287 = shalt.err (!%p284_p1)
}
  0x22   :  { %s320_s0 = smov 256   ;;  %s321_s9 = smov 16  }
  0x23   :  { %34 = dma.hbm_to_vmem [thread:$0]  %s390_s1, 4096, %s29_s27, [#allocation6], %s320_s0, %s320_s0, %s321_s9  }
  0x24   :  { %310 = dma.done.wait [#allocation3], 256  }
  0x25   :  { %311 = vsyncadd [#allocation3], 4294967040 }
  0x26   :  { %312 = dma.done.wait [#allocation6], 4096  }
  0x27   :  { %313 = vsyncadd [#allocation6], 4294963200  ;;  %v322_v0 = vmov 0.0   ;;  %v46_v1 = vld [vmem:[#allocation5 + $0x8] sm:$0xff]  ;;  %v48_v2 = vld [vmem:[#allocation5 + $0x18] sm:$0xff]  ;;  %v79_v51 = vlaneseq  ;;  %s323_s13 = smov [#allocation7]  }
  0x28   :  { %153 = vmatprep.mubr.f32.mxu0 %v322_v0  ;;  %159 = vmatprep.mubr.f32.mxu1 %v322_v0  ;;  %v45_v3 = vld [vmem:[#allocation5] sm:$0xff]  ;;  %v188_v4 = vpack.c.bf16 %v48_v2, %v46_v1  ;;  %v47_v5 = vld [vmem:[#allocation5 + $0x10] sm:$0xff]  ;;  %v50_v6 = vld [vmem:[#allocation5 + $0x28] sm:$0xff]  ;;  %s175_s14 = sshll.u32 %s323_s13, 4  ;;  %s176_s14 = int_to_ptr.vmem [resolvable:$true] %s175_s14 }
  0x29   :  { %v52_v7 = vld [vmem:[#allocation5 + $0x38] sm:$0xff]  ;;  %v190_v8 = vpack.c.bf16 %v47_v5, %v45_v3  ;;  %v49_v10 = vld [vmem:[#allocation5 + $0x20] sm:$0xff]  ;;  %v51_v11 = vld [vmem:[#allocation5 + $0x30] sm:$0xff]  ;;  %v80_v52 = vshrl.u32 %v79_v51, 7  ;;  %s288_s15 = scalar_lea.vmem %s176_s14, 256  ;;  %p293_p3 = scmp.lt.s32.totalorder %s176_s14, %s176_s14 }
  0x2a   :  { %v192_v9 = vpack.c.bf16 %v52_v7, %v50_v6  ;;  %v54_v12 = vld [vmem:[#allocation5 + $0x48] sm:$0xff]  ;;  %189 = vmatprep.subr.bf16.mxu0 %v188_v4  ;;  %220 = vmatprep.subr.bf16.mxu1 %v188_v4  ;;  %v56_v13 = vld [vmem:[#allocation5 + $0x58] sm:$0xff]  ;;  %v194_v14 = vpack.c.bf16 %v51_v11, %v49_v10  ;;  %v53_v16 = vld [vmem:[#allocation5 + $0x40] sm:$0xff]  ;;  %p289_p2 = scmp.ne.s32.totalorder %s176_s14, %s288_s15  ;;  %p294_p4 = scmp.lt.s32.totalorder %s288_s15, %s288_s15 }
  0x2b   :  { %191 = vmatpush1.bf16.msra.mxu0 %v190_v8  ;;  %228 = vmatpush1.bf16.msra.mxu1 %v190_v8  ;;  %v196_v15 = vpack.c.bf16 %v56_v13, %v54_v12  ;;  %v55_v17 = vld [vmem:[#allocation5 + $0x50] sm:$0xff]  ;;  %v58_v18 = vld [vmem:[#allocation5 + $0x68] sm:$0xff]  ;;  %v60_v19 = vld [vmem:[#allocation5 + $0x78] sm:$0xff]  ;;  %v81_v53 = vsub.s32 0, %v80_v52  ;;  %v85_v55 = vsub.s32 1, %v80_v52 }
  0x2c   :  { %193 = vmatprep.subr.bf16.mxu0 %v192_v9  ;;  %221 = vmatprep.subr.bf16.mxu1 %v192_v9  ;;  %v198_v20 = vpack.c.bf16 %v55_v17, %v53_v16  ;;  %v200_v21 = vpack.c.bf16 %v60_v19, %v58_v18  ;;  %v57_v22 = vld [vmem:[#allocation5 + $0x60] sm:$0xff]  ;;  %v59_v23 = vld [vmem:[#allocation5 + $0x70] sm:$0xff]  ;;  %v62_v24 = vld [vmem:[#allocation5 + $0x88] sm:$0xff]  ;;  %p295_p5 = por %p294_p4, %p293_p3 }
  0x2d   :  { %v64_v25 = vld [vmem:[#allocation5 + $0x98] sm:$0xff]  ;;  %v202_v26 = vpack.c.bf16 %v59_v23, %v57_v22  ;;  %v61_v28 = vld [vmem:[#allocation5 + $0x80] sm:$0xff]  ;;  %v63_v29 = vld [vmem:[#allocation5 + $0x90] sm:$0xff] }
  0x2e   :  { %v204_v27 = vpack.c.bf16 %v64_v25, %v62_v24  ;;  %v66_v30 = vld [vmem:[#allocation5 + $0xa8] sm:$0xff]  ;;  %v68_v31 = vld [vmem:[#allocation5 + $0xb8] sm:$0xff]  ;;  %v206_v32 = vpack.c.bf16 %v63_v29, %v61_v28  ;;  %v65_v34 = vld [vmem:[#allocation5 + $0xa0] sm:$0xff]  ;;  %p296_p6 = pnand %p295_p5, %p289_p2 }
  0x2f   :  { %195 = vmatpush1.bf16.msra.mxu0 %v194_v14  ;;  %229 = vmatpush1.bf16.msra.mxu1 %v194_v14  ;;  %v208_v33 = vpack.c.bf16 %v68_v31, %v66_v30  ;;  %v67_v35 = vld [vmem:[#allocation5 + $0xb0] sm:$0xff]  ;;  %v70_v36 = vld [vmem:[#allocation5 + $0xc8] sm:$0xff]  ;;  %v72_v37 = vld [vmem:[#allocation5 + $0xd8] sm:$0xff] }
  0x30   :  { %197 = vmatprep.subr.bf16.mxu0 %v196_v15  ;;  %222 = vmatprep.subr.bf16.mxu1 %v196_v15  ;;  %v210_v38 = vpack.c.bf16 %v67_v35, %v65_v34  ;;  %v212_v39 = vpack.c.bf16 %v72_v37, %v70_v36  ;;  %v69_v40 = vld [vmem:[#allocation5 + $0xc0] sm:$0xff]  ;;  %v71_v41 = vld [vmem:[#allocation5 + $0xd0] sm:$0xff]  ;;  %v74_v42 = vld [vmem:[#allocation5 + $0xe8] sm:$0xff] }
  0x31   :  { %v76_v43 = vld [vmem:[#allocation5 + $0xf8] sm:$0xff]  ;;  %v214_v44 = vpack.c.bf16 %v71_v41, %v69_v40  ;;  %v73_v46 = vld [vmem:[#allocation5 + $0xe0] sm:$0xff]  ;;  %v75_v47 = vld [vmem:[#allocation5 + $0xf0] sm:$0xff] }
  0x32   :  { %v216_v45 = vpack.c.bf16 %v76_v43, %v74_v42  ;;  %v218_v48 = vpack.c.bf16 %v75_v47, %v73_v46  ;;  %v43_v49 = vld [vmem:[#allocation2] sm:$0xff]  ;;  %v44_v50 = vld [vmem:[#allocation2 + $0x8] sm:$0xff] }
  0x33   :  { %199 = vmatpush1.bf16.msra.mxu0 %v198_v20  ;;  %230 = vmatpush1.bf16.msra.mxu1 %v198_v20  ;;  %v77_v54 = vld [vmem:[%s391_s2] sm:$0x3] }
  0x34   :  { %201 = vmatprep.subr.bf16.mxu0 %v200_v21  ;;  %223 = vmatprep.subr.bf16.mxu1 %v200_v21  ;;  %v82_v56 = vrot.slane %v77_v54, %v81_v53  ;;  %v86_v57 = vrot.slane %v77_v54, %v85_v55 }
  0x37   :  { %203 = vmatpush1.bf16.msra.mxu0 %v202_v26  ;;  %231 = vmatpush1.bf16.msra.mxu1 %v202_v26 }
  0x38   :  { %205 = vmatprep.subr.bf16.mxu0 %v204_v27  ;;  %224 = vmatprep.subr.bf16.mxu1 %v204_v27 }
  0x3b   :  { %207 = vmatpush1.bf16.msra.mxu0 %v206_v32  ;;  %232 = vmatpush1.bf16.msra.mxu1 %v206_v32 }
  0x3c   :  { %209 = vmatprep.subr.bf16.mxu0 %v208_v33  ;;  %225 = vmatprep.subr.bf16.mxu1 %v208_v33 }
  0x3f   :  { %211 = vmatpush1.bf16.msra.mxu0 %v210_v38  ;;  %233 = vmatpush1.bf16.msra.mxu1 %v210_v38 }
  0x40   :  { %213 = vmatprep.subr.bf16.mxu0 %v212_v39  ;;  %226 = vmatprep.subr.bf16.mxu1 %v212_v39 }
  0x43   :  { %215 = vmatpush1.bf16.msra.mxu0 %v214_v44  ;;  %234 = vmatpush1.bf16.msra.mxu1 %v214_v44 }
  0x44   :  { %217 = vmatprep.subr.bf16.mxu0 %v216_v45  ;;  %227 = vmatprep.subr.bf16.mxu1 %v216_v45 }
  0x47   :  { %219 = vmatpush1.bf16.msra.mxu0 %v218_v48  ;;  %235 = vmatpush1.bf16.msra.mxu1 %v218_v48 }
  0x4a   :  { %154 = vmatmul.mubr.f32.vlgmr.msra.gmra.mrb[0].mxu0 %v43_v49  ;;  %160 = vmatmul.mubr.f32.vlgmr.msra.gmra.mrb[0].mxu1 %v44_v50 }
 0x11d   :  { %v155_v58 = vpop.f32.mrb[0].mxu0  ;;  %v161_v59 = vpop.f32.mrb[0].mxu1 }
 0x11e   :  { %v156_v60 = vadd.f32 %v155_v58, %v82_v56  ;;  %v162_v61 = vadd.f32 %v161_v59, %v82_v56  ;;  %v157_v62 = vpop.f32.mrb[1].mxu0  ;;  %v163_v63 = vpop.f32.mrb[1].mxu1 }
 0x11f   :  { %v158_v0 = vadd.f32 %v157_v62, %v86_v57  ;;  %v164_v1 = vadd.f32 %v163_v63, %v86_v57 }
 0x121   :  { %v166_v2 = vmul.f32 %v158_v0, %v156_v60  ;;  %v167_v3 = vmul.f32 %v164_v1, %v162_v61 }
 0x123   :  { %168 = vst [vmem:[#allocation7] sm:$0xff] %v166_v2  ;;  %169 = vst [vmem:[#allocation7 + $0x8] sm:$0xff] %v167_v3 }
 0x124   :  { %299 = shalt.err (!%p296_p6)
}
 0x125   :  { %s300_s17 = scalar_lea.hbm %s392_s3, 256 }
 0x126   :  { %p301_p7 = scmp.ne.s32.totalorder %s392_s3, %s300_s17  ;;  %p304_p8 = scmp.lt.u32.totalorder %s300_s17, %s392_s3 }
 0x128   :  { %p306_p9 = pnand %p304_p8, %p301_p7 }
 0x12a   :  { %309 = shalt.err (!%p306_p9)
}
 0x12b   :  { %181 = dma.vmem_to_hbm [thread:$0]  %s176_s14, 256, %s392_s3, [#allocation4], %s317_s22, %s317_s22, %s318_s23  }
 0x12c   :  { %314 = dma.done.wait [#allocation4], 256  }
 0x12d   :  { %315 = vsyncadd [#allocation4], 4294967040 }
 0x12e   :  { %185 = vsyncpa [#allocation3], 1 }
 0x12f   :  { %186 = vsyncpa [#allocation6], 1 }
 0x130   :  { %187 = vsyncpa [#allocation4], 1 }

</bundles_post_ra>
